<compile_context>
chip_gen: v6e
topology: v6e:2x2x1
jax: 0.10.0
libtpu: 0.0.40
codegen_flags: <defaults>
</compile_context>

<pallas_src>
import functools

import jax
import jax.numpy as jnp
import numpy as np
from jax.experimental import pallas as pl
from jax.experimental.pallas import tpu as pltpu

# Raise v5e's 16 MiB default scoped VMEM; still <= physical on v5e/v6e/v7x.
_VMEM_LIMIT_BYTES = 32 * 1024 * 1024


def _round_up(x, m):
    return ((x + m - 1) // m) * m


# ----------------------------------------------------------------------------
# Kernel 1: tiled spatial-sum reduction over HW (accumulator pattern)
# ----------------------------------------------------------------------------
def row_sum_kernel(x_ref, sum_ref, *, lane_tile, hw, mask_lanes):
    # x_ref:   [R, L] tile of the flattened [B*C, H*W] activation.
    # sum_ref: [R, 1] accumulator; constant output block index along the last
    #          ("arbitrary") grid axis, so it stays resident in VMEM.
    j = pl.program_id(1)

    @pl.when(j == 0)
    def _():
        sum_ref[...] = jnp.zeros_like(sum_ref)

    x = x_ref[...]
    if mask_lanes:
        # Lane remainder of the last block reads undefined data; zero it so it
        # can't corrupt the per-(B,C) sums. (Row-remainder garbage only feeds
        # out-of-bounds output rows, which Pallas clips on store.)
        lane = jax.lax.broadcasted_iota(jnp.int32, x.shape, dimension=1)
        x = jnp.where(lane + j * lane_tile < hw, x, 0.0)
    sum_ref[...] += jnp.sum(x, axis=-1, keepdims=True)


def _spatial_sum(x2, R, L, HW):
    rows = x2.shape[0]
    return pl.pallas_call(
        functools.partial(row_sum_kernel, lane_tile=L, hw=HW,
                          mask_lanes=(HW % L != 0)),
        out_shape=jax.ShapeDtypeStruct((rows, 1), jnp.float32),
        grid=(pl.cdiv(rows, R), pl.cdiv(HW, L)),
        in_specs=[pl.BlockSpec((R, L), lambda i, j: (i, j))],
        out_specs=pl.BlockSpec((R, 1), lambda i, j: (i, 0)),
        compiler_params=pltpu.CompilerParams(
            dimension_semantics=("parallel", "arbitrary"),
            vmem_limit_bytes=_VMEM_LIMIT_BYTES),
        cost_estimate=pl.CostEstimate(
            flops=rows * HW, transcendentals=0,
            bytes_accessed=4 * rows * HW + 4 * rows),
    )(x2)


# ----------------------------------------------------------------------------
# Kernel 2: dynamic-ReLU elementwise max over k piecewise-linear branches
# ----------------------------------------------------------------------------
def drelu_kernel(x_ref, coef_ref, o_ref, *, k):
    # x_ref: [R, L]; coef_ref: [R, 2k] (k slopes then k offsets); o_ref: [R, L]
    x = x_ref[...]
    coef = coef_ref[...]
    res = x * coef[:, 0:1] + coef[:, k:k + 1]        # [R,1] broadcasts over lanes
    for j in range(1, k):
        res = jnp.maximum(res, x * coef[:, j:j + 1] + coef[:, k + j:k + j + 1])
    o_ref[...] = res


# ----------------------------------------------------------------------------
# Wrapper
# ----------------------------------------------------------------------------
def dynamic_relu_b(x, w1, b1, w2, b2, lambdas, init_v, *, k=2,
                   row_tile=256, lane_tile=2048, red_lane_tile=4096):
    """x: [B, C, H, W] float32 (NCHW). Returns [B, C, H, W]."""
    B, C, H, W = x.shape
    HW = H * W
    rows = B * C

    # Pure view; no materialized padded copy.
    x2 = x.reshape(rows, HW).astype(jnp.float32)

    # Tile sizes obey the (8, 128) layout rule; partial edge blocks are handled
    # by the pl.cdiv grids (clipped writes + in-kernel lane mask for kernel 1).
    R = min(row_tile, _round_up(rows, 8))
    L1 = min(red_lane_tile, _round_up(HW, 128))   # reduction: bigger lane tile
    L2 = min(lane_tile, _round_up(HW, 128))       # elementwise pass

    # ---- coefficient path: Pallas tiled reduction + tiny MLP in plain XLA ----
    sums = _spatial_sum(x2, R, L1, HW)                           # [rows, 1]
    theta = sums[:, 0].reshape(B, C) / jnp.float32(HW)           # [B, C]
    h = jnp.maximum(theta @ w1 + b1, 0.0)                        # [B, C//r]
    t = h @ w2 + b2                                              # [B, 2kC]
    t = 2.0 * jax.nn.sigmoid(t) - 1.0
    relu_coefs = t.reshape(B, C, 2 * k) * lambdas + init_v       # [B, C, 2k]
    coefs = relu_coefs.reshape(rows, 2 * k).astype(jnp.float32)  # [rows, 2k]

    # ---- dynamic-ReLU elementwise pass (HBM-bound; both grid axes parallel) --
    # Note (v7x): with tiny B*C the row axis may be a single block; the lane
    # axis is also "parallel" so both TensorCores still get work on real shapes.
    out = pl.pallas_call(
        functools.partial(drelu_kernel, k=k),
        out_shape=jax.ShapeDtypeStruct((rows, HW), jnp.float32),
        grid=(pl.cdiv(rows, R), pl.cdiv(HW, L2)),
        in_specs=[pl.BlockSpec((R, L2), lambda i, j: (i, j)),
                  pl.BlockSpec((R, 2 * k), lambda i, j: (i, 0))],
        out_specs=pl.BlockSpec((R, L2), lambda i, j: (i, j)),
        compiler_params=pltpu.CompilerParams(
            dimension_semantics=("parallel", "parallel"),
            vmem_limit_bytes=_VMEM_LIMIT_BYTES),
        cost_estimate=pl.CostEstimate(
            flops=(3 * k - 1) * rows * HW, transcendentals=0,
            bytes_accessed=8 * rows * HW + 4 * rows * 2 * k),
    )(x2, coefs)

    return out.reshape(B, C, H, W)


# ----------------------------------------------------------------------------
# Pure-JAX reference (mirrors the PyTorch forward exactly)
# ----------------------------------------------------------------------------
def dynamic_relu_b_ref(x, w1, b1, w2, b2, lambdas, init_v, *, k=2):
    B, C, H, W = x.shape
    theta = jnp.mean(x, axis=-1)          # mean over W -> [B, C, H]
    theta = jnp.mean(theta, axis=-1)      # mean over H -> [B, C]
    theta = jnp.maximum(theta @ w1 + b1, 0.0)
    theta = theta @ w2 + b2
    theta = 2.0 * jax.nn.sigmoid(theta) - 1.0
    relu_coefs = theta.reshape(-1, C, 2 * k) * lambdas + init_v        # [B, C, 2k]
    x_perm = jnp.transpose(x, (2, 3, 0, 1))[..., None]                 # [H, W, B, C, 1]
    output = x_perm * relu_coefs[:, :, :k] + relu_coefs[:, :, k:]      # [H, W, B, C, k]
    result = jnp.max(output, axis=-1)                                  # [H, W, B, C]
    return jnp.transpose(result, (2, 3, 0, 1))                         # [B, C, H, W]


if __name__ == "__main__":
    # Module config
    B, C, H, W = 2, 8, 16, 16
    k, reduction = 2, 4
    hidden = C // reduction

    key = jax.random.PRNGKey(0)
    kx, kw1, kb1, kw2, kb2 = jax.random.split(key, 5)

    x = jax.random.normal(kx, (B, C, H, W), dtype=jnp.float32)

    # Deterministic synthetic parameters (nn.Linear shapes, stored as [in, out]
    # so the forward does theta @ W directly).
    w1 = 0.3 * jax.random.normal(kw1, (C, hidden), dtype=jnp.float32)
    b1 = 0.1 * jax.random.normal(kb1, (hidden,), dtype=jnp.float32)
    w2 = 0.3 * jax.random.normal(kw2, (hidden, 2 * k * C), dtype=jnp.float32)
    b2 = 0.1 * jax.random.normal(kb2, (2 * k * C,), dtype=jnp.float32)

    lambdas = jnp.array([1.0] * k + [0.5] * k, dtype=jnp.float32)
    init_v = jnp.array([1.0] + [0.0] * (2 * k - 1), dtype=jnp.float32)

    out = dynamic_relu_b(x, w1, b1, w2, b2, lambdas, init_v, k=k)
    out = jax.block_until_ready(out)

    ref = dynamic_relu_b_ref(x, w1, b1, w2, b2, lambdas, init_v, k=k)
    np.testing.assert_allclose(np.asarray(out), np.asarray(ref), rtol=1e-5, atol=1e-5)

    print("KERNEL_OK")
</pallas_src>

<mosaic_0001>
module attributes {stable_mosaic.version = 11 : i64} {
  func.func @row_sum_kernel(%arg0: i32, %arg1: i32, %arg2: memref<16x256xf32, #tpu.memory_space<vmem>>, %arg3: memref<16x1xf32, #tpu.memory_space<vmem>>) attributes {dimension_semantics = [#tpu.dimension_semantics<parallel>, #tpu.dimension_semantics<arbitrary>], iteration_bounds = array<i64: 1, 1>, scalar_prefetch = 0 : i64, scratch_operands = 0 : i64, tpu.core_type = #tpu.core_type<tc>, window_params = [{transform_indices = @transform_0, window_bounds = array<i64: 16, 256>}, {transform_indices = @transform_1, window_bounds = array<i64: 16, 1>}]} {
    %c0_i32 = arith.constant 0 : i32
    %0 = arith.cmpi eq, %arg1, %c0_i32 : i32
    %1 = arith.extui %0 : i1 to i32
    %c0_i32_0 = arith.constant 0 : i32
    %2 = arith.cmpi ne, %1, %c0_i32_0 : i32
    scf.if %2 {
      %cst_6 = arith.constant 0.000000e+00 : f32
      %9 = vector.broadcast %cst_6 : f32 to vector<16x1xf32>
      %c0_7 = arith.constant 0 : index
      %c0_8 = arith.constant 0 : index
      %10 = vector.load %arg3[%c0_7, %c0_8] : memref<16x1xf32, #tpu.memory_space<vmem>>, vector<16x1xf32>
      tpu.vector_store %arg3[%c0_7, %c0_8], %9 {strides = array<i32>} : memref<16x1xf32, #tpu.memory_space<vmem>>, vector<16x1xf32>,
    } else {
    }
    %c0 = arith.constant 0 : index
    %c0_1 = arith.constant 0 : index
    %3 = vector.load %arg2[%c0, %c0_1] : memref<16x256xf32, #tpu.memory_space<vmem>>, vector<16x256xf32>
    %c0_2 = arith.constant 0 : index
    %c0_3 = arith.constant 0 : index
    %4 = vector.load %arg3[%c0_2, %c0_3] : memref<16x1xf32, #tpu.memory_space<vmem>>, vector<16x1xf32>
    %cst = arith.constant dense<0.000000e+00> : vector<16xf32>
    %5 = vector.multi_reduction <add>, %3, %cst [1] : vector<16x256xf32> to vector<16xf32>
    %6 = vector.shape_cast %5 : vector<16xf32> to vector<16x1xf32>
    %7 = arith.addf %4, %6 : vector<16x1xf32>
    %c0_4 = arith.constant 0 : index
    %c0_5 = arith.constant 0 : index
    %8 = vector.load %arg3[%c0_4, %c0_5] : memref<16x1xf32, #tpu.memory_space<vmem>>, vector<16x1xf32>
    tpu.vector_store %arg3[%c0_4, %c0_5], %7 {strides = array<i32>} : memref<16x1xf32, #tpu.memory_space<vmem>>, vector<16x1xf32>,
    return
  }
  func.func @transform_0(%arg0: i32, %arg1: i32) -> (i32, i32) {
    %c0_i32 = arith.constant 0 : i32
    return %arg0, %arg1 : i32, i32
  }
  func.func @transform_1(%arg0: i32, %arg1: i32) -> (i32, i32) {
    %c0_i32 = arith.constant 0 : i32
    %c0_i32_0 = arith.constant 0 : i32
    return %arg0, %c0_i32 : i32, i32
  }
}

</mosaic_0001>

<bundles_post_ra>
// kernel: tpu_custom_call.1
= control target key start
LH: loop header
LB: loop body
LE: loop exit
PB: predicated region body
PF: predicated region fallthrough
CT: control target
= control target key end

     0   :  { %6 = vsyncpa [#allocation3], 0  ;;  %s77_s6 = smov [#allocation2]   ;;  %s116_s0 = inlined_call_operand.hbm [shape: f32[16,256], index: 0, kind: input, shape index: {}]   ;;  %s117_s1 = inlined_call_operand.vmem [shape: f32[16,1], index: 1, kind: output, shape index: {}]  }
   0x1   :  { %s12_s7 = sshll.u32 %s77_s6, 4  ;;  %s13_s7 = int_to_ptr.vmem [resolvable:$true] %s12_s7 }
   0x2   :  { %s63_s8 = scalar_lea.vmem %s13_s7, 512  ;;  %p68_p1 = scmp.lt.s32.totalorder %s13_s7, %s13_s7 }
   0x3   :  { %p64_p0 = scmp.ne.s32.totalorder %s13_s7, %s63_s8  ;;  %p69_p2 = scmp.lt.s32.totalorder %s63_s8, %s63_s8 }
   0x5   :  { %p70_p3 = por %p69_p2, %p68_p1 }
   0x7   :  { %p71_p4 = pnand %p70_p3, %p64_p0 }
   0x9   :  { %74 = shalt.err (!%p71_p4)
}
   0xa   :  { %s78_s9 = smov 256   ;;  %s79_s10 = smov 16  }
   0xb   :  { %18 = dma.hbm_to_vmem [thread:$0]  %s116_s0, 512, %s13_s7, [#allocation3], %s78_s9, %s78_s9, %s79_s10  }
   0xc   :  { %75 = dma.done.wait [#allocation3], 512  }
   0xd   :  { %76 = vsyncadd [#allocation3], 4294966784  ;;  %vm26_vm0 = vcmask 7168   ;;  %v80_v0 = vmov 0.0   ;;  %v29_v1 = vld [vmem:[#allocation2] sm:$0xff]  ;;  %v30_v2 = vld [vmem:[#allocation2 + $0x8] sm:$0xff] }
   0xe   :  { %27 = vst.msk [vmem:[%s117_s1] sm:$0xff] %vm26_vm0, %v80_v0  ;;  %28 = vst.msk [vmem:[%s117_s1 + $0x8] sm:$0xff] %vm26_vm0, %v80_v0  ;;  %v31_v3 = vld [vmem:[#allocation2 + $0x10] sm:$0xff]  ;;  %v35_v4 = vadd.f32 %v30_v2, %v29_v1  ;;  %v32_v5 = vld [vmem:[#allocation2 + $0x18] sm:$0xff] }
   0xf   :  { %v38_v6 = vadd.f32 %v32_v5, %v31_v3 }
  0x10   :  { %36 = vadd.xlane.f32.xlu0 %v35_v4 }
  0x14   :  { %39 = vadd.xlane.f32.xlu0 %v38_v6 }
  0x15   :  { %v33_v7 = vld [vmem:[%s117_s1] sm:$0xff]  ;;  %v34_v10 = vld [vmem:[%s117_s1 + $0x8] sm:$0xff] }
  0x99   :  { %v37_v8 = vpop.xlane.xlu0 %36 }
  0x9a   :  { %v41_v9 = vadd.f32 %v37_v8, %v33_v7 }
  0x9c   :  { %44 = vst.msk [vmem:[%s117_s1] sm:$0xff] %vm26_vm0, %v41_v9 }
  0x9d   :  { %v40_v11 = vpop.xlane.xlu0 %39 }
  0x9e   :  { %v42_v12 = vadd.f32 %v40_v11, %v34_v10 }
  0xa0   :  { %45 = vst.msk [vmem:[%s117_s1 + $0x8] sm:$0xff] %vm26_vm0, %v42_v12 }
  0xa1   :  { %50 = vsyncpa [#allocation3], 1 }

</bundles_post_ra>
